<compile_context>
chip_gen: v7x
topology: tpu7x:2x2x1
jax: 0.10.0
libtpu: 0.0.40
codegen_flags: <defaults>
</compile_context>

<pallas_src>
import functools

import jax
import jax.numpy as jnp
from jax.experimental import pallas as pl
from jax.experimental.pallas import tpu as pltpu


def _round_up(a: int, b: int) -> int:
    return (a + b - 1) // b * b


# --------------------------------- kernels --------------------------------- #

def _gemm_bias_kernel(x_ref, w_ref, bias_ref, o_ref):
    """Fast path: the whole contraction fits in one K tile -> no accumulator."""
    acc = jnp.dot(x_ref[...], w_ref[...], preferred_element_type=jnp.float32)
    o_ref[...] = (acc + bias_ref[...]).astype(o_ref.dtype)


def _gemm_bias_acc_kernel(x_ref, w_ref, bias_ref, o_ref, acc_ref):
    """General path: accumulate over the K grid axis in an f32 VMEM scratch."""
    k = pl.program_id(2)

    @pl.when(k == 0)
    def _():
        acc_ref[...] = jnp.zeros_like(acc_ref)

    acc_ref[...] += jnp.dot(x_ref[...], w_ref[...],
                            preferred_element_type=jnp.float32)

    @pl.when(k == pl.num_programs(2) - 1)
    def _():
        o_ref[...] = (acc_ref[...] + bias_ref[...]).astype(o_ref.dtype)


# ----------------------------- tiling heuristics --------------------------- #

def _choose_kn_tiles(K: int, N: int):
    # K (contraction): lane dim of x, sublane dim of W^T.  Prefer one big tile
    # (accumulator-free path); otherwise the largest of {512, 256, 128} that
    # divides the padded K (avoids extra weight padding).
    Kp = _round_up(K, 128)
    if Kp <= 1024:
        tk = Kp
    elif Kp % 512 == 0:
        tk = 512
    elif Kp % 256 == 0:
        tk = 256
    else:
        tk = 128
    # N (out_features): lane dim of W^T and the output -> lane-dense stores.
    # Prefer multiples of 256 (v6e/v7x MXU fill) while keeping >= 2 N blocks
    # where possible (v7x megacore split when the M grid collapses to 1).
    Np = _round_up(N, 128)
    if Np % 512 == 0 and Np >= 1024:
        tn = 512
    elif Np % 256 == 0 and Np >= 512:
        tn = 256
    else:
        tn = 128
    return Kp, tk, Np, tn


# ------------------------------ pallas wrapper ------------------------------ #

def _linear_svdo_call(x, wt_p, bias_p, *, K, N, Kp, tk, Np, tn):
    """x: (B, K).  wt_p: (Kp, Np) masked W^T (padded).  bias_p: (1, Np) f32."""
    B = x.shape[0]
    assert x.shape[1] == K

    cdt = wt_p.dtype          # compute dtype (bf16 params stay bf16 -> native MXU)
    out_dtype = x.dtype

    tm = min(256, _round_up(B, 8))
    Mp = _round_up(B, tm)
    x_p = jnp.pad(x.astype(cdt), ((0, Mp - B), (0, Kp - K)))

    gm, gn, gk = Mp // tm, Np // tn, Kp // tk

    esize = jnp.dtype(cdt).itemsize
    osize = jnp.dtype(out_dtype).itemsize
    cost = pl.CostEstimate(
        flops=2 * Mp * Np * Kp,
        transcendentals=0,
        bytes_accessed=esize * (Mp * Kp + Kp * Np) + 4 * Np + osize * Mp * Np)

    # Per-step VMEM footprint (double-buffered ins/outs + f32 accumulator).
    vmem_need = (2 * (tm * tk + tk * tn) * esize
                 + 2 * tm * tn * osize
                 + tm * tn * 4
                 + 4 * tn * 4)
    vmem_limit = max(32 * 1024 * 1024, min(48 * 1024 * 1024, 2 * vmem_need))

    out_shape = jax.ShapeDtypeStruct((Mp, Np), out_dtype)

    if gk == 1:
        out_p = pl.pallas_call(
            _gemm_bias_kernel,
            out_shape=out_shape,
            grid_spec=pltpu.PrefetchScalarGridSpec(
                num_scalar_prefetch=0,
                grid=(gm, gn),
                in_specs=[
                    pl.BlockSpec((tm, tk), lambda i, j: (i, 0)),   # x tile
                    pl.BlockSpec((tk, tn), lambda i, j: (0, j)),   # masked W^T tile
                    pl.BlockSpec((1, tn), lambda i, j: (0, j)),    # bias tile
                ],
                out_specs=pl.BlockSpec((tm, tn), lambda i, j: (i, j)),
            ),
            compiler_params=pltpu.CompilerParams(
                dimension_semantics=("parallel", "parallel"),
                vmem_limit_bytes=vmem_limit,
            ),
            cost_estimate=cost,
        )(x_p, wt_p, bias_p)
    else:
        out_p = pl.pallas_call(
            _gemm_bias_acc_kernel,
            out_shape=out_shape,
            grid_spec=pltpu.PrefetchScalarGridSpec(
                num_scalar_prefetch=0,
                grid=(gm, gn, gk),
                in_specs=[
                    pl.BlockSpec((tm, tk), lambda i, j, k: (i, k)),
                    pl.BlockSpec((tk, tn), lambda i, j, k: (k, j)),
                    pl.BlockSpec((1, tn), lambda i, j, k: (0, j)),
                ],
                out_specs=pl.BlockSpec((tm, tn), lambda i, j, k: (i, j)),
                scratch_shapes=[pltpu.VMEM((tm, tn), jnp.float32)],
            ),
            compiler_params=pltpu.CompilerParams(
                dimension_semantics=("parallel", "parallel", "arbitrary"),
                vmem_limit_bytes=vmem_limit,
            ),
            cost_estimate=cost,
        )(x_p, wt_p, bias_p)

    return out_p[:B, :N]


def linear_svdo_prepare(W, log_sigma, bias):
    """Parameter-only preprocessing, hoisted out of the per-call path.

    Folds the sparse-VD mask into the weights:
        log_alpha < 3  <=>  |W| + 1e-16 > exp(log_sigma - 1.5)
    (the clamp(-10, 10) is monotone with 3 strictly inside it, so the predicate
    is unchanged), transposes to (K, N) so out_features is the lane dim, and
    zero-pads to the tile grid.  In eval mode the parameters are static, so
    this runs once.
    """
    N, K = W.shape
    Kp, tk, Np, tn = _choose_kn_tiles(K, N)

    keep = (jnp.abs(W.astype(jnp.float32)) + 1e-16
            > jnp.exp(log_sigma.astype(jnp.float32) - 1.5))
    w_eff_t = jnp.where(keep, W, jnp.zeros_like(W)).T           # (K, N), W's dtype
    wt_p = jnp.pad(w_eff_t, ((0, Kp - K), (0, Np - N)))
    bias_p = jnp.pad(bias.astype(jnp.float32).reshape(1, -1),
                     ((0, 0), (0, Np - N)))
    dims = dict(K=K, N=N, Kp=Kp, tk=tk, Np=Np, tn=tn)
    return wt_p, bias_p, dims


def make_linear_svdo(W, log_sigma, bias):
    """Build a jitted eval-mode forward: x -> x @ (masked W)^T + bias."""
    wt_p, bias_p, dims = linear_svdo_prepare(W, log_sigma, bias)

    def apply(x):
        return _linear_svdo_call(x, wt_p, bias_p, **dims)

    return jax.jit(apply)


def linear_svdo_forward(x, W, log_sigma, bias):
    """One-shot convenience wrapper (prepare + apply)."""
    wt_p, bias_p, dims = linear_svdo_prepare(W, log_sigma, bias)
    return _linear_svdo_call(x, wt_p, bias_p, **dims)


# ----------------------------------- test ----------------------------------- #

def _reference(x, W, log_sigma, bias):
    log_alpha = jnp.clip(
        2.0 * log_sigma - 2.0 * jnp.log(1e-16 + jnp.abs(W)), -10.0, 10.0)
    w_eff = W * (log_alpha < 3.0).astype(W.dtype)
    return x @ w_eff.T + bias


if __name__ == "__main__":
    key = jax.random.PRNGKey(0)
    kx, kw, kb, kx2, kw2, ks2, kb2 = jax.random.split(key, 7)

    # --- Test 1: small shapes (single-K-tile fast path) ---------------------
    batch, in_features, out_features = 8, 32, 16
    W = 0.02 * jax.random.normal(kw, (out_features, in_features), jnp.float32)
    log_sigma = jnp.full((out_features, in_features), -5.0, jnp.float32)
    bias = 0.1 * jax.random.normal(kb, (1, out_features), jnp.float32)
    x = jax.random.normal(kx, (batch, in_features), jnp.float32)

    fwd = make_linear_svdo(W, log_sigma, bias)   # parameter prep hoisted, once
    y = jax.block_until_ready(fwd(x))
    y_ref = _reference(x, W, log_sigma, bias)
    assert y.shape == y_ref.shape
    assert jnp.allclose(y, y_ref, atol=1e-5, rtol=1e-5), "mismatch (small case)"

    # --- Test 2: larger K exercises the multi-K-tile accumulator path -------
    batch2, in2, out2 = 8, 1536, 16
    W2 = 0.02 * jax.random.normal(kw2, (out2, in2), jnp.float32)
    log_sigma2 = jax.random.uniform(ks2, (out2, in2), jnp.float32, -6.0, 0.0)
    bias2 = 0.1 * jax.random.normal(kb2, (1, out2), jnp.float32)
    x2 = jax.random.normal(kx2, (batch2, in2), jnp.float32)

    y2 = jax.block_until_ready(linear_svdo_forward(x2, W2, log_sigma2, bias2))
    y2_ref = _reference(x2, W2, log_sigma2, bias2)
    assert y2.shape == y2_ref.shape
    assert jnp.allclose(y2, y2_ref, atol=1e-3, rtol=1e-3), "mismatch (multi-K case)"

    print("KERNEL_OK")
</pallas_src>

<mosaic_0001>
module attributes {stable_mosaic.version = 11 : i64} {
  func.func @_gemm_bias_kernel(%arg0: i32, %arg1: i32, %arg2: memref<8x128xf32, #tpu.memory_space<vmem>>, %arg3: memref<128x128xf32, #tpu.memory_space<vmem>>, %arg4: memref<1x128xf32, #tpu.memory_space<vmem>>, %arg5: memref<8x128xf32, #tpu.memory_space<vmem>>) attributes {dimension_semantics = [#tpu.dimension_semantics<parallel>, #tpu.dimension_semantics<parallel>], iteration_bounds = array<i64: 1, 1>, scalar_prefetch = 0 : i64, scratch_operands = 0 : i64, tpu.core_type = #tpu.core_type<tc>, window_params = [{transform_indices = @transform_0, window_bounds = array<i64: 8, 128>}, {transform_indices = @transform_1, window_bounds = array<i64: 128, 128>}, {transform_indices = @transform_2, window_bounds = array<i64: 1, 128>}, {transform_indices = @transform_3, window_bounds = array<i64: 8, 128>}]} {
    %c0 = arith.constant 0 : index
    %c0_0 = arith.constant 0 : index
    %0 = vector.load %arg2[%c0, %c0_0] : memref<8x128xf32, #tpu.memory_space<vmem>>, vector<8x128xf32>
    %c0_1 = arith.constant 0 : index
    %c0_2 = arith.constant 0 : index
    %1 = vector.load %arg3[%c0_1, %c0_2] : memref<128x128xf32, #tpu.memory_space<vmem>>, vector<128x128xf32>
    %cst = arith.constant dense<0.000000e+00> : vector<8x128xf32>
    %2 = tpu.matmul %0, %1, %cst {dimension_numbers = #tpu.dot_dimension_numbers<[1], [0], [0], [1], [0, 0, 1, 1], [], []>} : vector<8x128xf32>, vector<128x128xf32>, vector<8x128xf32> -> vector<8x128xf32>
    %c0_3 = arith.constant 0 : index
    %c0_4 = arith.constant 0 : index
    %3 = vector.load %arg4[%c0_3, %c0_4] : memref<1x128xf32, #tpu.memory_space<vmem>>, vector<1x128xf32>
    %4 = vector.broadcast %3 : vector<1x128xf32> to vector<8x128xf32>
    %5 = arith.addf %2, %4 : vector<8x128xf32>
    %c0_5 = arith.constant 0 : index
    %c0_6 = arith.constant 0 : index
    %6 = vector.load %arg5[%c0_5, %c0_6] : memref<8x128xf32, #tpu.memory_space<vmem>>, vector<8x128xf32>
    tpu.vector_store %arg5[%c0_5, %c0_6], %5 {strides = array<i32>} : memref<8x128xf32, #tpu.memory_space<vmem>>, vector<8x128xf32>,
    return
  }
  func.func @transform_0(%arg0: i32, %arg1: i32) -> (i32, i32) {
    %c0_i32 = arith.constant 0 : i32
    %c0_i32_0 = arith.constant 0 : i32
    return %arg0, %c0_i32 : i32, i32
  }
  func.func @transform_1(%arg0: i32, %arg1: i32) -> (i32, i32) {
    %c0_i32 = arith.constant 0 : i32
    %c0_i32_0 = arith.constant 0 : i32
    return %c0_i32, %arg1 : i32, i32
  }
  func.func @transform_2(%arg0: i32, %arg1: i32) -> (i32, i32) {
    %c0_i32 = arith.constant 0 : i32
    %c0_i32_0 = arith.constant 0 : i32
    return %c0_i32, %arg1 : i32, i32
  }
  func.func @transform_3(%arg0: i32, %arg1: i32) -> (i32, i32) {
    %c0_i32 = arith.constant 0 : i32
    return %arg0, %arg1 : i32, i32
  }
}

</mosaic_0001>

<bundles_post_ra>
// kernel: apply.1
= control target key start
LH: loop header
LB: loop body
LE: loop exit
PB: predicated region body
PF: predicated region fallthrough
CT: control target
= control target key end

     0   :  { %8 = vsyncpa [#allocation3], 0  ;;  %s328_s0 = inlined_call_operand.vmem [shape: f32[8,128], index: 0, kind: input, shape index: {}]   ;;  %s329_s1 = inlined_call_operand.hbm [shape: f32[128,128], index: 1, kind: input, shape index: {}]   ;;  %s330_s2 = inlined_call_operand.vmem [shape: f32[1,128], index: 2, kind: input, shape index: {}]   ;;  %s331_s3 = inlined_call_operand.hbm [shape: f32[8,128], index: 3, kind: output, shape index: {}]  }
   0x1   :  { %9 = vsyncpa [#allocation4], 0  ;;  %s271_s12 = smov [#allocation2]   ;;  %s223_s16 = scalar_lea.hbm %s329_s1, 2048 }
   0x2   :  { %s17_s13 = sshll.u32 %s271_s12, 4  ;;  %p224_p0 = scmp.ne.s32.totalorder %s329_s1, %s223_s16  ;;  %s18_s13 = int_to_ptr.vmem [resolvable:$true] %s17_s13 }
   0x3   :  { %p227_p1 = scmp.lt.u32.totalorder %s223_s16, %s329_s1 }
   0x5   :  { %p229_p2 = pnand %p227_p1, %p224_p0 }
   0x7   :  { %232 = shalt.err (!%p229_p2)
}
   0x8   :  { %s233_s21 = scalar_lea.vmem %s18_s13, 2048  ;;  %p238_p4 = scmp.lt.s32.totalorder %s18_s13, %s18_s13 }
   0x9   :  { %p234_p3 = scmp.ne.s32.totalorder %s18_s13, %s233_s21  ;;  %p239_p5 = scmp.lt.s32.totalorder %s233_s21, %s233_s21 }
   0xb   :  { %p240_p6 = por %p239_p5, %p238_p4 }
   0xd   :  { %p241_p7 = pnand %p240_p6, %p234_p3 }
   0xf   :  { %244 = shalt.err (!%p241_p7)
}
  0x10   :  { %s272_s22 = smov 128   ;;  %s273_s23 = smov 8  }
  0x11   :  { %23 = dma.hbm_to_vmem [thread:$0]  %s329_s1, 2048, %s18_s13, [#allocation3], %s272_s22, %s272_s22, %s273_s23  }
  0x12   :  { %267 = dma.done.wait [#allocation3], 2048  }
  0x13   :  { %268 = vsyncadd [#allocation3], 4294965248  ;;  %v274_v0 = vmov 0.0|0.0   ;;  %vm275_vm0 = vmmov 0   ;;  %v276_v1 = vmov 0.0   ;;  %v30_v2 = vld [vmem:[#allocation2] sm:$0xff] }
  0x14   :  { %192 = vmatprep.subr.bf16.mxu0 %v274_v0  ;;  %189 = vmatprep.mubr.msk.f32.mxu0 %vm275_vm0, %v276_v1  ;;  %v31_v3 = vld [vmem:[#allocation2 + $0x8] sm:$0xff]  ;;  %v32_v4 = vld [vmem:[#allocation2 + $0x10] sm:$0xff]  ;;  %v33_v6 = vld [vmem:[#allocation2 + $0x18] sm:$0xff]  ;;  %s277_s29 = smov [#allocation5]  }
  0x15   :  { %v193_v5 = vpack.c.bf16 %v31_v3, %v30_v2  ;;  %v196_v7 = vpack.c.bf16 %v33_v6, %v32_v4  ;;  %v34_v8 = vld [vmem:[#allocation2 + $0x20] sm:$0xff]  ;;  %v35_v9 = vld [vmem:[#allocation2 + $0x28] sm:$0xff]  ;;  %v36_v11 = vld [vmem:[#allocation2 + $0x30] sm:$0xff]  ;;  %s130_s30 = sshll.u32 %s277_s29, 4  ;;  %s131_s30 = int_to_ptr.vmem [resolvable:$true] %s130_s30 }
  0x16   :  { %v199_v10 = vpack.c.bf16 %v35_v9, %v34_v8  ;;  %v37_v12 = vld [vmem:[#allocation2 + $0x38] sm:$0xff]  ;;  %v38_v14 = vld [vmem:[#allocation2 + $0x40] sm:$0xff]  ;;  %v39_v15 = vld [vmem:[#allocation2 + $0x48] sm:$0xff]  ;;  %s245_s4 = scalar_lea.vmem %s131_s30, 128  ;;  %p250_p9 = scmp.lt.s32.totalorder %s131_s30, %s131_s30 }
  0x17   :  { %194 = vmatpush3.bf16.msra.mxu0 %v193_v5  ;;  %v202_v13 = vpack.c.bf16 %v37_v12, %v36_v11  ;;  %v205_v16 = vpack.c.bf16 %v39_v15, %v38_v14  ;;  %v40_v17 = vld [vmem:[#allocation2 + $0x50] sm:$0xff]  ;;  %v41_v18 = vld [vmem:[#allocation2 + $0x58] sm:$0xff]  ;;  %v42_v20 = vld [vmem:[#allocation2 + $0x60] sm:$0xff]  ;;  %p246_p8 = scmp.ne.s32.totalorder %s131_s30, %s245_s4  ;;  %p251_p10 = scmp.lt.s32.totalorder %s245_s4, %s245_s4 }
  0x18   :  { %195 = vmatprep.subr.bf16.mxu0 %v274_v0  ;;  %v208_v19 = vpack.c.bf16 %v41_v18, %v40_v17  ;;  %v43_v21 = vld [vmem:[#allocation2 + $0x68] sm:$0xff]  ;;  %v44_v23 = vld [vmem:[#allocation2 + $0x70] sm:$0xff]  ;;  %v45_v24 = vld [vmem:[#allocation2 + $0x78] sm:$0xff] }
  0x19   :  { %v211_v22 = vpack.c.bf16 %v43_v21, %v42_v20  ;;  %v214_v25 = vpack.c.bf16 %v45_v24, %v44_v23  ;;  %v29_v26 = vld [vmem:[%s328_s0] sm:$0xff]  ;;  %p252_p11 = por %p251_p10, %p250_p9 }
  0x1a   :  { %v139_v27 = vld [vmem:[%s330_s2] ss:$0 sm:$0xff] }
  0x1b   :  { %197 = vmatpush3.bf16.msra.mxu0 %v196_v7  ;;  %p253_p12 = pnand %p252_p11, %p246_p8 }
  0x1c   :  { %198 = vmatprep.subr.bf16.mxu0 %v274_v0 }
  0x1f   :  { %200 = vmatpush3.bf16.msra.mxu0 %v199_v10 }
  0x20   :  { %201 = vmatprep.subr.bf16.mxu0 %v274_v0 }
  0x23   :  { %203 = vmatpush3.bf16.msra.mxu0 %v202_v13 }
  0x24   :  { %204 = vmatprep.subr.bf16.mxu0 %v274_v0 }
  0x27   :  { %206 = vmatpush3.bf16.msra.mxu0 %v205_v16 }
  0x28   :  { %207 = vmatprep.subr.bf16.mxu0 %v274_v0 }
  0x2b   :  { %209 = vmatpush3.bf16.msra.mxu0 %v208_v19 }
  0x2c   :  { %210 = vmatprep.subr.bf16.mxu0 %v274_v0 }
  0x2f   :  { %212 = vmatpush3.bf16.msra.mxu0 %v211_v22 }
  0x30   :  { %213 = vmatprep.subr.bf16.mxu0 %v274_v0 }
  0x33   :  { %215 = vmatpush3.bf16.msra.mxu0 %v214_v25 }
  0x36   :  { %190 = vmatmul.mubr.f32.vlgmr.msra.gmra.mrb[0].mxu0 %v29_v26 }
 0x109   :  { %v119_v28 = vpop.f32.mrb[0].mxu0 }
 0x10a   :  { %v120_v29 = vadd.f32 %v139_v27, %v119_v28  ;;  %v191_v30 = vpop.f32.mrb[1].mxu0 }
 0x10c   :  { %123 = vst [vmem:[#allocation5] sm:$0xff] %v120_v29 }
 0x10d   :  { %256 = shalt.err (!%p253_p12)
}
 0x10e   :  { %s257_s6 = scalar_lea.hbm %s331_s3, 128 }
 0x10f   :  { %p258_p13 = scmp.ne.s32.totalorder %s331_s3, %s257_s6  ;;  %p261_p0 = scmp.lt.u32.totalorder %s257_s6, %s331_s3 }
 0x111   :  { %p263_p1 = pnand %p261_p0, %p258_p13 }
 0x113   :  { %266 = shalt.err (!%p263_p1)
}
 0x114   :  { %133 = dma.vmem_to_hbm [thread:$0]  %s131_s30, 128, %s331_s3, [#allocation4]  }
 0x115   :  { %269 = dma.done.wait [#allocation4], 128  }
 0x116   :  { %270 = vsyncadd [#allocation4], 4294967168 }
 0x117   :  { %137 = vsyncpa [#allocation3], 1 }
 0x118   :  { %138 = vsyncpa [#allocation4], 1 }

</bundles_post_ra>
